<compile_context>
chip_gen: v6e
topology: v6e:2x2x1
jax: 0.10.0
libtpu: 0.0.40
codegen_flags: <defaults>
</compile_context>

<pallas_src>
import jax
import jax.numpy as jnp
from jax.experimental import pallas as pl
from jax.experimental.pallas import tpu as pltpu


_HIDDEN = 64     # per-head hidden width (from the module: Linear(..., 64))
_WIDTH = 128     # fused lane width (two 64-wide heads side by side)
_MAX_ROW_TILE = 512


def _round_up(x: int, m: int) -> int:
    return (x + m - 1) // m * m


def _make_icm_kernel(obs_size: int, width: int = _WIDTH):
    """Fused two-head MLP kernel. Closure over static shape info."""

    def kernel(x_ref, w_ref, b_ref, out_ref):
        x = x_ref[...]                               # (rows, 128) bf16

        # Packed bf16 weight slab: rows [0,128) W1, [128,256) W2, [256,384) W3.
        w1 = w_ref[0:width, :]
        w2 = w_ref[width:2 * width, :]
        w3 = w_ref[2 * width:3 * width, :]
        # f32 bias slab: row 0 = b1, row 1 = b2, row 2 = b3 (rest zero).
        b1 = b_ref[0:1, :]
        b2 = b_ref[1:2, :]
        b3 = b_ref[2:3, :]

        # bf16 MXU matmuls with f32 accumulation; bias/tanh/round in f32.
        h = jnp.tanh(jnp.dot(x, w1, preferred_element_type=jnp.float32) + b1)
        h = jnp.tanh(jnp.dot(h.astype(jnp.bfloat16), w2,
                             preferred_element_type=jnp.float32) + b2)
        z = jnp.dot(h.astype(jnp.bfloat16), w3,
                    preferred_element_type=jnp.float32) + b3

        # Output lanes: [pred_next_state (obs) | pred_action (act) | 0-pad].
        # torch.round == round-half-to-even == jnp.round; only applied to the
        # pred_next lanes.
        lane = jax.lax.broadcasted_iota(jnp.int32, z.shape, 1)
        out_ref[...] = jnp.where(lane < obs_size, jnp.round(z), z)

    return kernel


def pack_params(params, obs_size: int, act_size: int,
                hidden: int = _HIDDEN, width: int = _WIDTH):
    """Pack weights into one (384,128) bf16 slab and biases into (8,128) f32."""
    assert 2 * hidden == width
    assert 2 * obs_size + act_size <= width, "fused input lanes must fit in 128"
    assert obs_size + act_size <= width, "fused output lanes must fit in 128"

    # Layer 1: input lanes are [state | next_state | action | pad].
    w1 = jnp.zeros((width, width), jnp.float32)
    # head A (Invpred_act) consumes cat([state, next_state]) -> cols [0,64)
    w1 = w1.at[:2 * obs_size, :hidden].set(params["w1a"])
    # head S (Pred_next_state) consumes cat([state, action]) -> cols [64,128)
    w1 = w1.at[:obs_size, hidden:].set(params["w1s"][:obs_size])
    w1 = w1.at[2 * obs_size:2 * obs_size + act_size, hidden:].set(
        params["w1s"][obs_size:])

    # Layer 2: block diagonal.
    w2 = jnp.zeros((width, width), jnp.float32)
    w2 = w2.at[:hidden, :hidden].set(params["w2a"])
    w2 = w2.at[hidden:, hidden:].set(params["w2s"])

    # Layer 3: output lanes are [pred_next (obs) | pred_action (act) | pad].
    w3 = jnp.zeros((width, width), jnp.float32)
    w3 = w3.at[hidden:, :obs_size].set(params["w3s"])
    w3 = w3.at[:hidden, obs_size:obs_size + act_size].set(params["w3a"])

    w_slab = jnp.concatenate([w1, w2, w3], axis=0).astype(jnp.bfloat16)

    b1 = jnp.zeros((width,), jnp.float32)
    b1 = b1.at[:hidden].set(params["b1a"]).at[hidden:].set(params["b1s"])
    b2 = jnp.zeros((width,), jnp.float32)
    b2 = b2.at[:hidden].set(params["b2a"]).at[hidden:].set(params["b2s"])
    b3 = jnp.zeros((width,), jnp.float32)
    b3 = b3.at[:obs_size].set(params["b3s"])
    b3 = b3.at[obs_size:obs_size + act_size].set(params["b3a"])

    # Fixed 8-sublane f32 bias slab, decoupled from batch padding.
    b_slab = jnp.zeros((8, width), jnp.float32)
    b_slab = b_slab.at[0].set(b1).at[1].set(b2).at[2].set(b3)

    return w_slab, b_slab


@jax.jit
def icm_forward(state, next_state, action_params, w_slab, b_slab):
    """Returns (real_next_state, pred_next_state, pred_action) like ICM.forward."""
    B, obs = state.shape
    act = action_params.shape[1]
    width = _WIDTH
    assert 2 * obs + act <= width and obs + act <= width

    # Batch tiling: multiple of 16 (bf16 sublane tile), capped at 512 rows per
    # grid step; the grid axis is "parallel" so v7x's 2nd TensorCore is used
    # for large batches.
    row_tile = min(_round_up(max(B, 1), 16), _MAX_ROW_TILE)
    b_pad = _round_up(B, row_tile)
    num_tiles = b_pad // row_tile
    assert B <= b_pad

    # One lane-dense bf16 input slab: [state | next_state | action | 0-pad].
    x_cat = jnp.concatenate([state, next_state, action_params], axis=1)
    x_pad = jnp.pad(x_cat.astype(jnp.bfloat16),
                    ((0, b_pad - B), (0, width - x_cat.shape[1])))

    kernel = _make_icm_kernel(obs, width)

    out = pl.pallas_call(
        kernel,
        out_shape=jax.ShapeDtypeStruct((b_pad, width), jnp.float32),
        grid=(num_tiles,),
        in_specs=[
            pl.BlockSpec((row_tile, width), lambda i: (i, 0)),
            # Weights / biases: constant index_map -> stay VMEM-resident
            # across batch tiles (no re-DMA per tile).
            pl.BlockSpec(w_slab.shape, lambda i: (0, 0)),
            pl.BlockSpec(b_slab.shape, lambda i: (0, 0)),
        ],
        out_specs=pl.BlockSpec((row_tile, width), lambda i: (i, 0)),
        compiler_params=pltpu.CompilerParams(
            dimension_semantics=("parallel",)),
    )(x_pad, w_slab, b_slab)

    pred_next_state = out[:B, :obs]
    pred_action = out[:B, obs:obs + act]
    real_next_state = next_state
    return real_next_state, pred_next_state, pred_action


def init_params(key, obs_size, act_size, hidden=_HIDDEN):
    """Deterministic synthetic init (PyTorch-Linear-like uniform(+-1/sqrt(fan_in)))."""
    keys = jax.random.split(key, 6)

    def lin(k, fan_in, fan_out):
        bound = 1.0 / jnp.sqrt(jnp.float32(fan_in))
        kw, kb = jax.random.split(k)
        w = jax.random.uniform(kw, (fan_in, fan_out), jnp.float32, -bound, bound)
        b = jax.random.uniform(kb, (fan_out,), jnp.float32, -bound, bound)
        return w, b

    # Invpred_act: Linear(2*obs, 64) -> Tanh -> Linear(64, 64) -> Tanh -> Linear(64, act)
    w1a, b1a = lin(keys[0], 2 * obs_size, hidden)
    w2a, b2a = lin(keys[1], hidden, hidden)
    w3a, b3a = lin(keys[2], hidden, act_size)
    # Pred_next_state: Linear(obs+act, 64) -> Tanh -> Linear(64, 64) -> Tanh -> Linear(64, obs)
    w1s, b1s = lin(keys[3], obs_size + act_size, hidden)
    w2s, b2s = lin(keys[4], hidden, hidden)
    w3s, b3s = lin(keys[5], hidden, obs_size)

    return {
        "w1a": w1a, "b1a": b1a, "w2a": w2a, "b2a": b2a, "w3a": w3a, "b3a": b3a,
        "w1s": w1s, "b1s": b1s, "w2s": w2s, "b2s": b2s, "w3s": w3s, "b3s": b3s,
    }


def icm_forward_ref_f32(state, next_state, action_params, params):
    """Plain-JAX f32 reference of ICM.forward (torch semantics).

    Returns (real_next, pred_next_rounded, pred_action, pred_next_unrounded).
    """
    x = jnp.concatenate([state, next_state], axis=1)
    h = jnp.tanh(x @ params["w1a"] + params["b1a"])
    h = jnp.tanh(h @ params["w2a"] + params["b2a"])
    pred_action = h @ params["w3a"] + params["b3a"]

    y = jnp.concatenate([state, action_params], axis=1)
    g = jnp.tanh(y @ params["w1s"] + params["b1s"])
    g = jnp.tanh(g @ params["w2s"] + params["b2s"])
    z = g @ params["w3s"] + params["b3s"]
    return next_state, jnp.round(z), pred_action, z


def icm_forward_ref_bf16(state, next_state, action_params, params):
    """Plain-JAX reference mirroring the kernel's bf16-weight numerics.

    Returns (pred_next_unrounded, pred_action).
    """
    bf = jnp.bfloat16

    def mm(a, w):
        return jnp.dot(a.astype(bf), w.astype(bf),
                       preferred_element_type=jnp.float32)

    x = jnp.concatenate([state, next_state], axis=1)
    h = jnp.tanh(mm(x, params["w1a"]) + params["b1a"])
    h = jnp.tanh(mm(h, params["w2a"]) + params["b2a"])
    pred_action = mm(h, params["w3a"]) + params["b3a"]

    y = jnp.concatenate([state, action_params], axis=1)
    g = jnp.tanh(mm(y, params["w1s"]) + params["b1s"])
    g = jnp.tanh(mm(g, params["w2s"]) + params["b2s"])
    z = mm(g, params["w3s"]) + params["b3s"]
    return z, pred_action


if __name__ == "__main__":
    key = jax.random.PRNGKey(0)
    k_params, k_s, k_ns, k_a = jax.random.split(key, 4)

    B, OBS, ACT = 8, 16, 8  # small shapes consistent with the module

    params = init_params(k_params, OBS, ACT)
    w_slab, b_slab = pack_params(params, OBS, ACT)

    state = jax.random.normal(k_s, (B, OBS), jnp.float32)
    next_state = jax.random.normal(k_ns, (B, OBS), jnp.float32)
    action_params = jax.random.normal(k_a, (B, ACT), jnp.float32)

    real_ns, pred_ns, pred_act = icm_forward(
        state, next_state, action_params, w_slab, b_slab)
    jax.block_until_ready((real_ns, pred_ns, pred_act))

    # real_next_state is a pass-through.
    assert jnp.array_equal(real_ns, next_state)
    # pred_next_state is rounded (integral values).
    assert jnp.array_equal(pred_ns, jnp.round(pred_ns))

    # Tight check against a plain-JAX reference that mirrors the kernel's bf16
    # numerics (validates the packing / block-diagonal fusion / slicing).
    zq, paq = icm_forward_ref_bf16(state, next_state, action_params, params)
    assert jnp.allclose(pred_act, paq, atol=2e-3, rtol=2e-3)
    assert jnp.all(jnp.abs(pred_ns - zq) <= 0.5 + 2e-3)

    # Loose check against the f32 torch-semantics reference (bf16-quantization
    # error only; round may flip for values very near x.5 — allowed here).
    r_ns, r_pns, r_pa, r_z = icm_forward_ref_f32(
        state, next_state, action_params, params)
    assert jnp.array_equal(real_ns, r_ns)
    assert jnp.allclose(pred_act, r_pa, atol=0.15, rtol=0.15)
    assert jnp.all(jnp.abs(pred_ns - r_z) <= 0.5 + 0.15)

    print("KERNEL_OK")
</pallas_src>

<mosaic_0001>
module attributes {stable_mosaic.version = 11 : i64} {
  func.func @kernel(%arg0: i32, %arg1: memref<16x128xbf16, #tpu.memory_space<vmem>>, %arg2: memref<384x128xbf16, #tpu.memory_space<vmem>>, %arg3: memref<8x128xf32, #tpu.memory_space<vmem>>, %arg4: memref<16x128xf32, #tpu.memory_space<vmem>>) attributes {dimension_semantics = [#tpu.dimension_semantics<parallel>], iteration_bounds = array<i64: 1>, scalar_prefetch = 0 : i64, scratch_operands = 0 : i64, tpu.core_type = #tpu.core_type<tc>, window_params = [{transform_indices = @transform_0, window_bounds = array<i64: 16, 128>}, {pipeline_mode = #tpu.pipeline_mode<synchronous>, transform_indices = @transform_1, window_bounds = array<i64: 384, 128>}, {pipeline_mode = #tpu.pipeline_mode<synchronous>, transform_indices = @transform_2, window_bounds = array<i64: 8, 128>}, {transform_indices = @transform_3, window_bounds = array<i64: 16, 128>}]} {
    %c0 = arith.constant 0 : index
    %c0_0 = arith.constant 0 : index
    %0 = vector.load %arg1[%c0, %c0_0] : memref<16x128xbf16, #tpu.memory_space<vmem>>, vector<16x128xbf16>
    %c0_1 = arith.constant 0 : index
    %c0_2 = arith.constant 0 : index
    %1 = vector.load %arg2[%c0_1, %c0_2] : memref<384x128xbf16, #tpu.memory_space<vmem>>, vector<128x128xbf16>
    %c128 = arith.constant 128 : index
    %c0_3 = arith.constant 0 : index
    %2 = vector.load %arg2[%c128, %c0_3] : memref<384x128xbf16, #tpu.memory_space<vmem>>, vector<128x128xbf16>
    %c256 = arith.constant 256 : index
    %c0_4 = arith.constant 0 : index
    %3 = vector.load %arg2[%c256, %c0_4] : memref<384x128xbf16, #tpu.memory_space<vmem>>, vector<128x128xbf16>
    %c0_5 = arith.constant 0 : index
    %c0_6 = arith.constant 0 : index
    %4 = vector.load %arg3[%c0_5, %c0_6] : memref<8x128xf32, #tpu.memory_space<vmem>>, vector<1x128xf32>
    %c1 = arith.constant 1 : index
    %c0_7 = arith.constant 0 : index
    %5 = vector.load %arg3[%c1, %c0_7] : memref<8x128xf32, #tpu.memory_space<vmem>>, vector<1x128xf32>
    %c2 = arith.constant 2 : index
    %c0_8 = arith.constant 0 : index
    %6 = vector.load %arg3[%c2, %c0_8] : memref<8x128xf32, #tpu.memory_space<vmem>>, vector<1x128xf32>
    %cst = arith.constant dense<0.000000e+00> : vector<16x128xf32>
    %7 = tpu.matmul %0, %1, %cst {dimension_numbers = #tpu.dot_dimension_numbers<[1], [0], [0], [1], [0, 0, 1, 1], [], []>} : vector<16x128xbf16>, vector<128x128xbf16>, vector<16x128xf32> -> vector<16x128xf32>
    %8 = vector.broadcast %4 : vector<1x128xf32> to vector<16x128xf32>
    %9 = arith.addf %7, %8 : vector<16x128xf32>
    %10 = math.tanh %9 : vector<16x128xf32>
    %11 = arith.truncf %10 : vector<16x128xf32> to vector<16x128xbf16>
    %cst_9 = arith.constant dense<0.000000e+00> : vector<16x128xf32>
    %12 = tpu.matmul %11, %2, %cst_9 {dimension_numbers = #tpu.dot_dimension_numbers<[1], [0], [0], [1], [0, 0, 1, 1], [], []>} : vector<16x128xbf16>, vector<128x128xbf16>, vector<16x128xf32> -> vector<16x128xf32>
    %13 = vector.broadcast %5 : vector<1x128xf32> to vector<16x128xf32>
    %14 = arith.addf %12, %13 : vector<16x128xf32>
    %15 = math.tanh %14 : vector<16x128xf32>
    %16 = arith.truncf %15 : vector<16x128xf32> to vector<16x128xbf16>
    %cst_10 = arith.constant dense<0.000000e+00> : vector<16x128xf32>
    %17 = tpu.matmul %16, %3, %cst_10 {dimension_numbers = #tpu.dot_dimension_numbers<[1], [0], [0], [1], [0, 0, 1, 1], [], []>} : vector<16x128xbf16>, vector<128x128xbf16>, vector<16x128xf32> -> vector<16x128xf32>
    %18 = vector.broadcast %6 : vector<1x128xf32> to vector<16x128xf32>
    %19 = arith.addf %17, %18 : vector<16x128xf32>
    %20 = tpu.iota {dimensions = array<i32: 1>} : vector<16x128xi32>
    %c16_i32 = arith.constant 16 : i32
    %21 = vector.broadcast %c16_i32 : i32 to vector<16x128xi32>
    %22 = arith.cmpi slt, %20, %21 : vector<16x128xi32>
    %23 = math.roundeven %19 : vector<16x128xf32>
    %24 = arith.select %22, %23, %19 : vector<16x128xi1>, vector<16x128xf32>
    %c0_11 = arith.constant 0 : index
    %c0_12 = arith.constant 0 : index
    %25 = vector.load %arg4[%c0_11, %c0_12] : memref<16x128xf32, #tpu.memory_space<vmem>>, vector<16x128xf32>
    tpu.vector_store %arg4[%c0_11, %c0_12], %24 {strides = array<i32>} : memref<16x128xf32, #tpu.memory_space<vmem>>, vector<16x128xf32>,
    return
  }
  func.func @transform_0(%arg0: i32) -> (i32, i32) {
    %c0_i32 = arith.constant 0 : i32
    %c0_i32_0 = arith.constant 0 : i32
    return %arg0, %c0_i32 : i32, i32
  }
  func.func @transform_1(%arg0: i32) -> (i32, i32) {
    %c0_i32 = arith.constant 0 : i32
    %c0_i32_0 = arith.constant 0 : i32
    %c0_i32_1 = arith.constant 0 : i32
    return %c0_i32, %c0_i32_0 : i32, i32
  }
  func.func @transform_2(%arg0: i32) -> (i32, i32) {
    %c0_i32 = arith.constant 0 : i32
    %c0_i32_0 = arith.constant 0 : i32
    %c0_i32_1 = arith.constant 0 : i32
    return %c0_i32, %c0_i32_0 : i32, i32
  }
  func.func @transform_3(%arg0: i32) -> (i32, i32) {
    %c0_i32 = arith.constant 0 : i32
    %c0_i32_0 = arith.constant 0 : i32
    return %arg0, %c0_i32 : i32, i32
  }
}

</mosaic_0001>

<bundles_post_ra>
// kernel: icm_forward.1
= control target key start
LH: loop header
LB: loop body
LE: loop exit
PB: predicated region body
PF: predicated region fallthrough
CT: control target
= control target key end

     0   :  { %8 = vsyncpa [#allocation3], 0  ;;  %s578_s12 = smov [#allocation2]   ;;  %s654_s0 = inlined_call_operand.vmem [shape: bf16[16,128], index: 0, kind: input, shape index: {}]   ;;  %s655_s1 = inlined_call_operand.hbm [shape: bf16[384,128], index: 1, kind: input, shape index: {}]   ;;  %s656_s2 = inlined_call_operand.vmem [shape: f32[8,128], index: 2, kind: input, shape index: {}]   ;;  %s657_s3 = inlined_call_operand.vmem [shape: f32[16,128], index: 3, kind: output, shape index: {}]  }
   0x1   :  { %s16_s13 = sshll.u32 %s578_s12, 4  ;;  %s17_s13 = int_to_ptr.vmem [resolvable:$true] %s16_s13 }
   0x2   :  { %s564_s14 = scalar_lea.vmem %s17_s13, 3072  ;;  %p569_p1 = scmp.lt.s32.totalorder %s17_s13, %s17_s13 }
   0x3   :  { %p565_p0 = scmp.ne.s32.totalorder %s17_s13, %s564_s14  ;;  %p570_p2 = scmp.lt.s32.totalorder %s564_s14, %s564_s14 }
   0x5   :  { %p571_p3 = por %p570_p2, %p569_p1 }
   0x7   :  { %p572_p4 = pnand %p571_p3, %p565_p0 }
   0x9   :  { %575 = shalt.err (!%p572_p4)
}
   0xa   :  { %s579_s15 = smov 64   ;;  %s580_s16 = smov 4  }
   0xb   :  { %22 = dma.hbm_to_vmem [thread:$0]  %s655_s1, 3072, %s17_s13, [#allocation3], %s579_s15, %s579_s15, %s580_s16  }
   0xc   :  { %576 = dma.done.wait [#allocation3], 3072  }
   0xd   :  { %577 = vsyncadd [#allocation3], 4294964224  ;;  %v581_v0 = vmov 0.0   ;;  %vm582_vm0 = vmmov 0   ;;  %v523_v1 = vld [vmem:[#allocation2 + $0x38] sm:$0xff]   ;;  %v524_v2 = vld [vmem:[#allocation2 + $0x30] sm:$0xff]   ;;  %v373_v49 = vlaneseq }
   0xe   :  { %442 = vmatprep.subr.bf16.mxu0 %v581_v0  ;;  %458 = vmatprep.mubr.msk.bf16.mxu0 %vm582_vm0, %v581_v0  ;;  %v525_v3 = vld [vmem:[#allocation2 + $0x28] sm:$0xff]   ;;  %v532_v4 = vld [vmem:[#allocation2 + $0x78] sm:$0xff]   ;;  %v526_v5 = vld [vmem:[#allocation2 + $0x20] sm:$0xff]  }
   0xf   :  { %462 = vmatprep.subr.bf16.mxu1 %v581_v0  ;;  %478 = vmatprep.mubr.msk.bf16.mxu1 %vm582_vm0, %v581_v0  ;;  %v533_v6 = vld [vmem:[#allocation2 + $0x70] sm:$0xff]   ;;  %v527_v7 = vld [vmem:[#allocation2 + $0x18] sm:$0xff]   ;;  %v529_v9 = vld [vmem:[#allocation2 + $0x8] sm:$0xff]   ;;  %v374_v53 = vand.u32 127, %v373_v49 }
  0x10   :  { %443 = vmatpush3.bf16.msra.mxu0 %v523_v1  ;;  %463 = vmatpush3.bf16.msra.mxu1 %v532_v4  ;;  %v528_v8 = vld [vmem:[#allocation2 + $0x10] sm:$0xff]   ;;  %v530_v10 = vld [vmem:[#allocation2] sm:$0xff]   ;;  %v534_v12 = vld [vmem:[#allocation2 + $0x68] sm:$0xff]  }
  0x11   :  { %444 = vmatprep.subr.bf16.mxu0 %v581_v0  ;;  %464 = vmatprep.subr.bf16.mxu1 %v581_v0  ;;  %v531_v11 = vld [vmem:[%s654_s0] sm:$0xff]   ;;  %v536_v14 = vld [vmem:[#allocation2 + $0x58] sm:$0xff]   ;;  %v537_v15 = vld [vmem:[#allocation2 + $0x50] sm:$0xff]   ;;  %vm375_vm1 = vcmp.lt.s32.totalorder %v374_v53, 16 }
  0x12   :  { %v535_v13 = vld [vmem:[#allocation2 + $0x60] sm:$0xff]   ;;  %v538_v16 = vld [vmem:[#allocation2 + $0x48] sm:$0xff]   ;;  %v540_v18 = vld [vmem:[#allocation2 + $0xb8] sm:$0xff]  }
  0x13   :  { %v539_v17 = vld [vmem:[#allocation2 + $0x40] sm:$0xff]   ;;  %v541_v19 = vld [vmem:[#allocation2 + $0xb0] sm:$0xff]   ;;  %v542_v30 = vld [vmem:[#allocation2 + $0xa8] sm:$0xff]  }
  0x14   :  { %445 = vmatpush3.bf16.msra.mxu0 %v524_v2  ;;  %465 = vmatpush3.bf16.msra.mxu1 %v533_v6  ;;  %v387_v20 = vld [vmem:[%s656_s2] ss:$0 sm:$0xff]  ;;  %v544_v32 = vld [vmem:[#allocation2 + $0x98] sm:$0xff]   ;;  %v545_v33 = vld [vmem:[#allocation2 + $0x90] sm:$0xff]  }
  0x15   :  { %446 = vmatprep.subr.bf16.mxu0 %v581_v0  ;;  %466 = vmatprep.subr.bf16.mxu1 %v581_v0  ;;  %v543_v31 = vld [vmem:[#allocation2 + $0xa0] sm:$0xff]   ;;  %v546_v34 = vld [vmem:[#allocation2 + $0x88] sm:$0xff]  }
  0x16   :  { %v547_v35 = vld [vmem:[#allocation2 + $0x80] sm:$0xff]  }
  0x17   :  { %v397_v36 = vld [vmem:[%s656_s2 + $0x1] ss:$0 sm:$0xff]  ;;  %v406_v46 = vld [vmem:[%s656_s2 + $0x2] ss:$0 sm:$0xff] }
  0x18   :  { %447 = vmatpush3.bf16.msra.mxu0 %v525_v3  ;;  %467 = vmatpush3.bf16.msra.mxu1 %v534_v12 }
  0x19   :  { %448 = vmatprep.subr.bf16.mxu0 %v581_v0  ;;  %468 = vmatprep.subr.bf16.mxu1 %v581_v0 }
  0x1c   :  { %449 = vmatpush3.bf16.msra.mxu0 %v526_v5  ;;  %469 = vmatpush3.bf16.msra.mxu1 %v535_v13 }
  0x1d   :  { %450 = vmatprep.subr.bf16.mxu0 %v581_v0  ;;  %470 = vmatprep.subr.bf16.mxu1 %v581_v0 }
  0x20   :  { %451 = vmatpush3.bf16.msra.mxu0 %v527_v7  ;;  %471 = vmatpush3.bf16.msra.mxu1 %v536_v14 }
  0x21   :  { %452 = vmatprep.subr.bf16.mxu0 %v581_v0  ;;  %472 = vmatprep.subr.bf16.mxu1 %v581_v0 }
  0x24   :  { %453 = vmatpush3.bf16.msra.mxu0 %v528_v8  ;;  %473 = vmatpush3.bf16.msra.mxu1 %v537_v15 }
  0x25   :  { %454 = vmatprep.subr.bf16.mxu0 %v581_v0  ;;  %474 = vmatprep.subr.bf16.mxu1 %v581_v0 }
  0x28   :  { %455 = vmatpush3.bf16.msra.mxu0 %v529_v9  ;;  %475 = vmatpush3.bf16.msra.mxu1 %v538_v16 }
  0x29   :  { %456 = vmatprep.subr.bf16.mxu0 %v581_v0  ;;  %476 = vmatprep.subr.bf16.mxu1 %v581_v0 }
  0x2c   :  { %457 = vmatpush3.bf16.msra.mxu0 %v530_v10  ;;  %477 = vmatpush3.bf16.msra.mxu1 %v539_v17 }
  0x2d   :  { %482 = vmatprep.subr.bf16.mxu0 %v581_v0 }
  0x2f   :  { %459 = vmatmul.mubr.bf16.vlgmr.msra.gmra.mxu0 %v531_v11 }
  0x30   :  { %498 = vmatprep.mubr.msk.bf16.mxu0 %vm582_vm0, %v581_v0  ;;  %483 = vmatpush3.bf16.msra.mxu0 %v540_v18 }
  0x31   :  { %484 = vmatprep.subr.bf16.mxu0 %v581_v0 }
  0x34   :  { %485 = vmatpush3.bf16.msra.mxu0 %v541_v19 }
  0x35   :  { %486 = vmatprep.subr.bf16.mxu0 %v581_v0 }
  0x38   :  { %487 = vmatpush3.bf16.msra.mxu0 %v542_v30 }
  0x39   :  { %488 = vmatprep.subr.bf16.mxu0 %v581_v0 }
  0x3c   :  { %489 = vmatpush3.bf16.msra.mxu0 %v543_v31 }
  0x3d   :  { %490 = vmatprep.subr.bf16.mxu0 %v581_v0 }
  0x40   :  { %491 = vmatpush3.bf16.msra.mxu0 %v544_v32 }
  0x41   :  { %492 = vmatprep.subr.bf16.mxu0 %v581_v0 }
  0x44   :  { %493 = vmatpush3.bf16.msra.mxu0 %v545_v33 }
  0x45   :  { %494 = vmatprep.subr.bf16.mxu0 %v581_v0 }
  0x48   :  { %495 = vmatpush3.bf16.msra.mxu0 %v546_v34 }
  0x49   :  { %496 = vmatprep.subr.bf16.mxu0 %v581_v0 }
  0x4c   :  { %497 = vmatpush3.bf16.msra.mxu0 %v547_v35 }
  0xef   :  { %v174_v21 = vpop.f32.mrf.mxu0 }
  0xf0   :  { %v175_v22 = vadd.f32 %v387_v20, %v174_v21 }
  0xf1   :  { %v460_v23 = vpop.f32.mrf.mxu0 }
  0xf2   :  { %548 = vtanh.f32 %v175_v22 }
  0xf3   :  { %v177_v24 = vpop.f32.mrf.mxu0 }
  0xf4   :  { %v178_v25 = vadd.f32 %v387_v20, %v177_v24 }
  0xf5   :  { %v461_v26 = vpop.f32.mrf.mxu0 }
  0xf6   :  { %550 = vtanh.f32 %v178_v25 }
  0xff   :  { %v549_v27 = vpop.eup %548 }
 0x103   :  { %v551_v28 = vpop.eup %550 }
 0x104   :  { %v183_v29 = vpack.c.bf16 %v551_v28, %v549_v27 }
 0x106   :  { %479 = vmatmul.mubr.bf16.vlgmr.msra.gmra.mxu1 %v183_v29 }
 0x1c6   :  { %v270_v37 = vpop.f32.mrf.mxu1 }
 0x1c7   :  { %v271_v38 = vadd.f32 %v397_v36, %v270_v37 }
 0x1c8   :  { %v480_v39 = vpop.f32.mrf.mxu1 }
 0x1c9   :  { %552 = vtanh.f32 %v271_v38 }
 0x1ca   :  { %v273_v40 = vpop.f32.mrf.mxu1 }
 0x1cb   :  { %v274_v41 = vadd.f32 %v397_v36, %v273_v40 }
 0x1cc   :  { %v481_v42 = vpop.f32.mrf.mxu1 }
 0x1cd   :  { %554 = vtanh.f32 %v274_v41 }
 0x1d6   :  { %v553_v43 = vpop.eup %552 }
 0x1da   :  { %v555_v44 = vpop.eup %554 }
 0x1db   :  { %v279_v45 = vpack.c.bf16 %v555_v44, %v553_v43 }
 0x1dd   :  { %499 = vmatmul.mubr.bf16.vlgmr.msra.gmra.mxu0 %v279_v45 }
 0x29d   :  { %v366_v47 = vpop.f32.mrf.mxu0 }
 0x29e   :  { %v367_v48 = vadd.f32 %v406_v46, %v366_v47 }
 0x29f   :  { %v500_v50 = vpop.f32.mrf.mxu0 }
 0x2a0   :  { %v504_v51 = vcvt.f32.s32 %v367_v48  ;;  %v502_v56 = vand.u32 2147483647, %v367_v48  ;;  %v507_v59 = vand.u32 2147483648, %v367_v48 }
 0x2a1   :  { %v369_v52 = vpop.f32.mrf.mxu0 }
 0x2a2   :  { %v505_v54 = vcvt.s32.f32 %v504_v51  ;;  %v370_v55 = vadd.f32 %v406_v46, %v369_v52  ;;  %vm503_vm2 = vcmp.lt.f32.partialorder %v502_v56, 8388608.0 }
 0x2a3   :  { %v501_v57 = vpop.f32.mrf.mxu0 }
 0x2a4   :  { %v506_v58 = vand.u32 2147483647, %v505_v54  ;;  %v512_v60 = vcvt.f32.s32 %v370_v55  ;;  %v510_v63 = vand.u32 2147483647, %v370_v55  ;;  %v515_v2 = vand.u32 2147483648, %v370_v55 }
 0x2a6   :  { %v508_v61 = vor.u32 %v507_v59, %v506_v58  ;;  %v513_v62 = vcvt.s32.f32 %v512_v60  ;;  %vm511_vm3 = vcmp.lt.f32.partialorder %v510_v63, 8388608.0 }
 0x2a8   :  { %v509_v0 = vsel %vm503_vm2, %v508_v61, %v367_v48  ;;  %v514_v1 = vand.u32 2147483647, %v513_v62 }
 0x2a9   :  { %v378_v3 = vsel %vm375_vm1, %v509_v0, %v367_v48 }
 0x2aa   :  { %380 = vst [vmem:[%s657_s3] sm:$0xff] %v378_v3  ;;  %v516_v4 = vor.u32 %v515_v2, %v514_v1 }
 0x2ac   :  { %v517_v5 = vsel %vm511_vm3, %v516_v4, %v370_v55 }
 0x2ad   :  { %v379_v6 = vsel %vm375_vm1, %v517_v5, %v370_v55 }
 0x2ae   :  { %381 = vst [vmem:[%s657_s3 + $0x8] sm:$0xff] %v379_v6 }
 0x2af   :  { %386 = vsyncpa [#allocation3], 1 }

</bundles_post_ra>
